<compile_context>
chip_gen: v6e
topology: v6e:2x2x1
jax: 0.10.0
libtpu: 0.0.40
codegen_flags: <defaults>
</compile_context>

<pallas_src>
import functools

import jax
import jax.numpy as jnp
from jax import lax
from jax.experimental import pallas as pl
from jax.experimental.pallas import tpu as pltpu


_GROUP = 128                          # one batch group = 128 samples (lane width)
_MAX_GROUPS_PER_STEP = 8              # up to 1024 lanes per grid step
_VMEM_TARGET_BYTES = 16 * 1024 * 1024 # per-step working-set target (v7x-safe)
_VMEM_LIMIT_BYTES = 32 * 1024 * 1024  # <= 32 MiB so it also fits v7x's 64 MiB VMEM


# ------------------------------ Pallas kernel ------------------------------ #
def _make_fused_kernel(*, K1, s1, Lout1, K2, p2, Lout2, nb):
    """Builds the fused (conv1 + ReLU + conv2 + ReLU) kernel body."""
    M1 = Lout1 * nb
    M2 = Lout2 * nb
    Hpad = (Lout1 + 2 * p2) * nb

    def kernel(x_ref, w1_ref, b1_ref, w2_ref, b2_ref, o_ref, h1p_ref):
        # ---- layer 1: Conv1d(Cin -> Cout1, K1, stride=s1) + ReLU ----------
        # x_ref is (s1, Cin, Lneed*nb): phase r holds padded time steps r::s1,
        # flattened with the nb-wide batch group on the lane axis, so every
        # tap is a static, 128-aligned lane slice. bf16 loads, f32 accumulate.
        acc1 = None
        for k in range(K1):
            off = (k // s1) * nb
            a_k = x_ref[k % s1, :, off:off + M1]               # (Cin, M1) bf16
            t = jnp.dot(w1_ref[k], a_k, preferred_element_type=jnp.float32)
            acc1 = t if acc1 is None else acc1 + t
        h1 = jnp.maximum(acc1 + b1_ref[...], 0.0)              # (Cout1, M1) f32

        # Stage the layer-1 activation in VMEM (bf16), zero-padded along time
        # for layer 2.  NOTE: edge writes stay unconditional -- the scratch is
        # per-core, so gating them on program_id would break under megacore
        # ("parallel") sharding.
        if p2 > 0:
            edge = jnp.zeros((h1.shape[0], p2 * nb), h1p_ref.dtype)
            h1p_ref[:, 0:p2 * nb] = edge
            h1p_ref[:, p2 * nb + M1:Hpad] = edge
        h1p_ref[:, p2 * nb:p2 * nb + M1] = h1.astype(h1p_ref.dtype)

        # ---- layer 2: Conv1d(Cout1 -> Cout2, K2, stride=1) + ReLU ---------
        acc2 = None
        for k in range(K2):
            b_k = h1p_ref[:, k * nb:k * nb + M2]               # (Cout1, M2) bf16
            t = jnp.dot(w2_ref[k], b_k, preferred_element_type=jnp.float32)
            acc2 = t if acc2 is None else acc2 + t
        o_ref[...] = jnp.maximum(acc2 + b2_ref[...], 0.0)      # (Cout2, M2) f32

    return kernel


# ------------------------- block-size (VMEM) sizing ------------------------- #
def _pick_groups_per_step(n_samples, *, Cin, Lneed, s1, Cout1, Lout1, p2,
                          Cout2, Lout2):
    """How many 128-sample batch groups to fuse into one grid step.

    Bigger blocks amortize grid-step overhead and push this memory-bound kernel
    toward the HBM roofline; the working set is capped so double-buffering fits
    v7x's 64 MiB VMEM, and we keep >= 2 grid steps when possible so the
    "parallel" axis feeds both v7x TensorCores.
    """
    g_total = max(1, -(-n_samples // _GROUP))
    gps = max(1, min(_MAX_GROUPS_PER_STEP, g_total // 2))
    # Per 128-sample group: double-buffered bf16 input block + bf16 h1 scratch
    # + double-buffered f32 output block + f32 in-kernel temporaries.
    per_group = (2 * s1 * Cin * Lneed * _GROUP * 2
                 + Cout1 * (Lout1 + 2 * p2) * _GROUP * 2
                 + 2 * Cout2 * Lout2 * _GROUP * 4
                 + (2 * Cout1 * Lout1 + 2 * Cout2 * Lout2 + Cin * Lout1) * _GROUP * 4)
    while gps > 1 and gps * per_group > _VMEM_TARGET_BYTES:
        gps -= 1
    return gps


# ------------------------------ fused forward ------------------------------ #
def _fused_forward(x, params, *, kernel_sizes, strides, paddings):
    if len(params) != 2:
        # TODO(synk): only the default two-layer conv stack is fused here.
        raise NotImplementedError("fused kernel supports exactly 2 conv layers")
    (w1, b1), (w2, b2) = params
    K1, K2 = kernel_sizes
    s1, s2 = strides
    p1, p2 = paddings
    # TODO(synk): layers after the first are fused assuming stride == 1.
    assert s2 == 1, "second conv layer must have stride 1"

    N, Cin, L = x.shape
    Cout1 = w1.shape[0]
    Cout2 = w2.shape[0]

    Lout1 = (L + 2 * p1 - K1) // s1 + 1
    Lout2 = (Lout1 + 2 * p2 - K2) // s2 + 1

    # Per-phase time length: must cover every layer-1 tap and the full padded
    # input (so the wrapper reshape is exact).  Loud failure for exotic
    # K1/s1/p1 combos instead of silent out-of-block reads.
    Lneed = max(Lout1 + (K1 - 1) // s1, -(-(L + 2 * p1) // s1))
    assert (K1 - 1) // s1 + Lout1 <= Lneed, (K1, s1, p1, L)

    gps = _pick_groups_per_step(N, Cin=Cin, Lneed=Lneed, s1=s1, Cout1=Cout1,
                                Lout1=Lout1, p2=p2, Cout2=Cout2, Lout2=Lout2)
    nb = gps * _GROUP
    G = -(-N // nb)
    Npad = G * nb
    M2 = Lout2 * nb
    Lpad_total = s1 * Lneed

    # Single layout pass over x: bf16 cast + zero pad + (free) reshapes + one
    # transpose -> (G, s1, Cin, Lneed*nb), batch group on the lane axis.
    xb = x.astype(jnp.bfloat16)
    xp = jnp.pad(xb, ((0, Npad - N), (0, 0), (p1, Lpad_total - L - p1)))
    xg = (xp.reshape(G, nb, Cin, Lneed, s1)
            .transpose(0, 4, 2, 3, 1)
            .reshape(G, s1, Cin, Lneed * nb))

    w1k = jnp.transpose(w1, (2, 0, 1)).astype(jnp.bfloat16)    # (K1, Cout1, Cin)
    w2k = jnp.transpose(w2, (2, 0, 1)).astype(jnp.bfloat16)    # (K2, Cout2, Cout1)
    b1m = b1.reshape(Cout1, 1).astype(jnp.float32)
    b2m = b2.reshape(Cout2, 1).astype(jnp.float32)

    kernel = _make_fused_kernel(K1=K1, s1=s1, Lout1=Lout1, K2=K2, p2=p2,
                                Lout2=Lout2, nb=nb)

    # Weight/bias blocks are constant across the grid -> Pallas keeps them
    # resident; they are a few KB so default buffering costs no real VMEM.
    in_specs = [
        pl.BlockSpec((None, s1, Cin, Lneed * nb), lambda g: (g, 0, 0, 0)),
        pl.BlockSpec((K1, Cout1, Cin), lambda g: (0, 0, 0)),
        pl.BlockSpec((Cout1, 1), lambda g: (0, 0)),
        pl.BlockSpec((K2, Cout2, Cout1), lambda g: (0, 0, 0)),
        pl.BlockSpec((Cout2, 1), lambda g: (0, 0)),
    ]

    out_flat = pl.pallas_call(
        kernel,
        out_shape=jax.ShapeDtypeStruct((G, Cout2, M2), jnp.float32),
        grid=(G,),
        in_specs=in_specs,
        out_specs=pl.BlockSpec((None, Cout2, M2), lambda g: (g, 0, 0)),
        scratch_shapes=[pltpu.VMEM((Cout1, (Lout1 + 2 * p2) * nb), jnp.bfloat16)],
        compiler_params=pltpu.CompilerParams(
            dimension_semantics=("parallel",),
            vmem_limit_bytes=_VMEM_LIMIT_BYTES,
        ),
    )(xg, w1k, b1m, w2k, b2m)

    # Back to the public NCL layout (one small transpose at the module boundary).
    out = out_flat.reshape(G, Cout2, Lout2, nb)
    out = out.transpose(0, 3, 1, 2).reshape(Npad, Cout2, Lout2)
    return out[:N]


# ------------------------------ module wrapper ------------------------------ #
class LstmCnn1dPallas:
    """Deterministic re-implementation of hydroDL LstmCnn1d.forward (conv stack)."""

    def __init__(self, *, nx, ny, rho, nkernel=(10, 5), kernelSize=(3, 3),
                 stride=(2, 1), padding=(1, 1), dr=0.5, poolOpt=None, key=None):
        if poolOpt is not None:
            # TODO(synk): MaxPool1d (poolOpt) branch is not implemented.
            raise NotImplementedError("poolOpt (MaxPool1d) path not supported")
        if len(nkernel) != 2:
            # TODO(synk): fused kernel covers the default two-layer stack only.
            raise NotImplementedError("only two conv layers supported")

        self.nx, self.ny, self.rho = nx, ny, rho
        self.nkernel, self.kernelSize = tuple(nkernel), tuple(kernelSize)
        self.stride, self.padding = tuple(stride), tuple(padding)
        if key is None:
            key = jax.random.PRNGKey(0)

        self.params = []
        ninchan = nx
        for ii in range(len(nkernel)):
            cout, k = nkernel[ii], kernelSize[ii]
            fan_in = ninchan * k
            bound = 1.0 / jnp.sqrt(jnp.float32(fan_in))   # PyTorch Conv1d default bound
            key, kw, kb = jax.random.split(key, 3)
            w = jax.random.uniform(kw, (cout, ninchan, k), jnp.float32, -bound, bound)
            b = jax.random.uniform(kb, (cout,), jnp.float32, -bound, bound)
            self.params.append((w, b))
            ninchan = cout

        self._forward = jax.jit(functools.partial(
            _fused_forward,
            kernel_sizes=self.kernelSize,
            strides=self.stride,
            paddings=self.padding))

    def __call__(self, x, doDropMC=False):
        # dr / doDropMC are unused in the reference forward (features only).
        return self._forward(x, self.params)


# -------------------------- pure-JAX reference (check) ---------------------- #
def _reference_forward(model, x):
    # Mirrors the kernel's bf16 storage (inputs, weights, staged intermediate
    # activation) with f32 accumulation, so the comparison isolates
    # indexing / fusion bugs rather than intentional bf16 quantization.
    q = lambda a: a.astype(jnp.bfloat16).astype(jnp.float32)
    out = q(x)
    n = len(model.params)
    for i, ((w, b), s, p) in enumerate(zip(model.params, model.stride, model.padding)):
        y = lax.conv_general_dilated(
            out, q(w), window_strides=(s,), padding=[(p, p)],
            dimension_numbers=("NCH", "OIH", "NCH"))
        out = jnp.maximum(y + b[None, :, None], 0.0)
        if i + 1 < n:
            out = q(out)   # kernel stages the intermediate activation in bf16 VMEM
    return out


if __name__ == "__main__":
    # Small shapes consistent with the module: x is (batch, nx, rho) in NCL.
    N, nx, rho = 2, 4, 16
    model = LstmCnn1dPallas(nx=nx, ny=1, rho=rho, key=jax.random.PRNGKey(0))

    x = jax.random.normal(jax.random.PRNGKey(0), (N, nx, rho), jnp.float32)

    out = jax.block_until_ready(model(x))

    ref = jax.block_until_ready(_reference_forward(model, x))
    assert out.shape == ref.shape == (N, 5, 8), (out.shape, ref.shape)
    assert jnp.allclose(out, ref, atol=1e-3, rtol=1e-3), \
        float(jnp.max(jnp.abs(out - ref)))

    print("KERNEL_OK")
</pallas_src>

<mosaic_0001>
module attributes {stable_mosaic.version = 11 : i64} {
  func.func @kernel(%arg0: i32, %arg1: memref<1x2x4x1152xbf16, #tpu.memory_space<vmem>>, %arg2: memref<3x10x4xbf16, #tpu.memory_space<vmem>>, %arg3: memref<10x1xf32, #tpu.memory_space<vmem>>, %arg4: memref<3x5x10xbf16, #tpu.memory_space<vmem>>, %arg5: memref<5x1xf32, #tpu.memory_space<vmem>>, %arg6: memref<1x5x1024xf32, #tpu.memory_space<vmem>>, %arg7: memref<10x1280xbf16, #tpu.memory_space<vmem>>) attributes {dimension_semantics = [#tpu.dimension_semantics<parallel>], iteration_bounds = array<i64: 1>, scalar_prefetch = 0 : i64, scratch_operands = 1 : i64, tpu.core_type = #tpu.core_type<tc>, window_params = [{transform_indices = @transform_0, window_bounds = array<i64: 1, 2, 4, 1152>}, {pipeline_mode = #tpu.pipeline_mode<synchronous>, transform_indices = @transform_1, window_bounds = array<i64: 3, 10, 4>}, {pipeline_mode = #tpu.pipeline_mode<synchronous>, transform_indices = @transform_2, window_bounds = array<i64: 10, 1>}, {pipeline_mode = #tpu.pipeline_mode<synchronous>, transform_indices = @transform_3, window_bounds = array<i64: 3, 5, 10>}, {pipeline_mode = #tpu.pipeline_mode<synchronous>, transform_indices = @transform_4, window_bounds = array<i64: 5, 1>}, {transform_indices = @transform_5, window_bounds = array<i64: 1, 5, 1024>}]} {
    %c0 = arith.constant 0 : index
    %c0_0 = arith.constant 0 : index
    %c0_1 = arith.constant 0 : index
    %c0_2 = arith.constant 0 : index
    %0 = vector.load %arg1[%c0, %c0_0, %c0_1, %c0_2] : memref<1x2x4x1152xbf16, #tpu.memory_space<vmem>>, vector<1x1x4x1024xbf16>
    %1 = vector.shape_cast %0 : vector<1x1x4x1024xbf16> to vector<4x1024xbf16>
    %c0_3 = arith.constant 0 : index
    %c0_4 = arith.constant 0 : index
    %c0_5 = arith.constant 0 : index
    %2 = vector.load %arg2[%c0_3, %c0_4, %c0_5] : memref<3x10x4xbf16, #tpu.memory_space<vmem>>, vector<1x10x4xbf16>
    %3 = vector.shape_cast %2 : vector<1x10x4xbf16> to vector<10x4xbf16>
    %cst = arith.constant dense<0.000000e+00> : vector<10x1024xf32>
    %4 = tpu.matmul %3, %1, %cst {dimension_numbers = #tpu.dot_dimension_numbers<[1], [0], [0], [1], [0, 0, 1, 1], [], []>} : vector<10x4xbf16>, vector<4x1024xbf16>, vector<10x1024xf32> -> vector<10x1024xf32>
    %c0_6 = arith.constant 0 : index
    %c1 = arith.constant 1 : index
    %c0_7 = arith.constant 0 : index
    %c0_8 = arith.constant 0 : index
    %5 = vector.load %arg1[%c0_6, %c1, %c0_7, %c0_8] : memref<1x2x4x1152xbf16, #tpu.memory_space<vmem>>, vector<1x1x4x1024xbf16>
    %6 = vector.shape_cast %5 : vector<1x1x4x1024xbf16> to vector<4x1024xbf16>
    %c1_9 = arith.constant 1 : index
    %c0_10 = arith.constant 0 : index
    %c0_11 = arith.constant 0 : index
    %7 = vector.load %arg2[%c1_9, %c0_10, %c0_11] : memref<3x10x4xbf16, #tpu.memory_space<vmem>>, vector<1x10x4xbf16>
    %8 = vector.shape_cast %7 : vector<1x10x4xbf16> to vector<10x4xbf16>
    %cst_12 = arith.constant dense<0.000000e+00> : vector<10x1024xf32>
    %9 = tpu.matmul %8, %6, %cst_12 {dimension_numbers = #tpu.dot_dimension_numbers<[1], [0], [0], [1], [0, 0, 1, 1], [], []>} : vector<10x4xbf16>, vector<4x1024xbf16>, vector<10x1024xf32> -> vector<10x1024xf32>
    %10 = arith.addf %4, %9 : vector<10x1024xf32>
    %c0_13 = arith.constant 0 : index
    %c0_14 = arith.constant 0 : index
    %c0_15 = arith.constant 0 : index
    %c128 = arith.constant 128 : index
    %11 = vector.load %arg1[%c0_13, %c0_14, %c0_15, %c128] : memref<1x2x4x1152xbf16, #tpu.memory_space<vmem>>, vector<1x1x4x1024xbf16>
    %12 = vector.shape_cast %11 : vector<1x1x4x1024xbf16> to vector<4x1024xbf16>
    %c2 = arith.constant 2 : index
    %c0_16 = arith.constant 0 : index
    %c0_17 = arith.constant 0 : index
    %13 = vector.load %arg2[%c2, %c0_16, %c0_17] : memref<3x10x4xbf16, #tpu.memory_space<vmem>>, vector<1x10x4xbf16>
    %14 = vector.shape_cast %13 : vector<1x10x4xbf16> to vector<10x4xbf16>
    %cst_18 = arith.constant dense<0.000000e+00> : vector<10x1024xf32>
    %15 = tpu.matmul %14, %12, %cst_18 {dimension_numbers = #tpu.dot_dimension_numbers<[1], [0], [0], [1], [0, 0, 1, 1], [], []>} : vector<10x4xbf16>, vector<4x1024xbf16>, vector<10x1024xf32> -> vector<10x1024xf32>
    %16 = arith.addf %10, %15 : vector<10x1024xf32>
    %c0_19 = arith.constant 0 : index
    %c0_20 = arith.constant 0 : index
    %17 = vector.load %arg3[%c0_19, %c0_20] : memref<10x1xf32, #tpu.memory_space<vmem>>, vector<10x1xf32>
    %18 = vector.broadcast %17 : vector<10x1xf32> to vector<10x1024xf32>
    %19 = arith.addf %16, %18 : vector<10x1024xf32>
    %cst_21 = arith.constant 0.000000e+00 : f32
    %20 = vector.broadcast %cst_21 : f32 to vector<10x1024xf32>
    %21 = arith.maximumf %19, %20 : vector<10x1024xf32>
    %cst_22 = arith.constant 0.000000e+00 : bf16
    %22 = vector.broadcast %cst_22 : bf16 to vector<10x128xbf16>
    %c0_23 = arith.constant 0 : index
    %c0_24 = arith.constant 0 : index
    %23 = vector.load %arg7[%c0_23, %c0_24] : memref<10x1280xbf16, #tpu.memory_space<vmem>>, vector<10x128xbf16>
    tpu.vector_store %arg7[%c0_23, %c0_24], %22 {strides = array<i32>} : memref<10x1280xbf16, #tpu.memory_space<vmem>>, vector<10x128xbf16>,
    %c0_25 = arith.constant 0 : index
    %c1152 = arith.constant 1152 : index
    %24 = vector.load %arg7[%c0_25, %c1152] : memref<10x1280xbf16, #tpu.memory_space<vmem>>, vector<10x128xbf16>
    tpu.vector_store %arg7[%c0_25, %c1152], %22 {strides = array<i32>} : memref<10x1280xbf16, #tpu.memory_space<vmem>>, vector<10x128xbf16>,
    %25 = arith.truncf %21 : vector<10x1024xf32> to vector<10x1024xbf16>
    %c0_26 = arith.constant 0 : index
    %c128_27 = arith.constant 128 : index
    %26 = vector.load %arg7[%c0_26, %c128_27] : memref<10x1280xbf16, #tpu.memory_space<vmem>>, vector<10x1024xbf16>
    tpu.vector_store %arg7[%c0_26, %c128_27], %25 {strides = array<i32>} : memref<10x1280xbf16, #tpu.memory_space<vmem>>, vector<10x1024xbf16>,
    %c0_28 = arith.constant 0 : index
    %c0_29 = arith.constant 0 : index
    %27 = vector.load %arg7[%c0_28, %c0_29] : memref<10x1280xbf16, #tpu.memory_space<vmem>>, vector<10x1024xbf16>
    %c0_30 = arith.constant 0 : index
    %c0_31 = arith.constant 0 : index
    %c0_32 = arith.constant 0 : index
    %28 = vector.load %arg4[%c0_30, %c0_31, %c0_32] : memref<3x5x10xbf16, #tpu.memory_space<vmem>>, vector<1x5x10xbf16>
    %29 = vector.shape_cast %28 : vector<1x5x10xbf16> to vector<5x10xbf16>
    %cst_33 = arith.constant dense<0.000000e+00> : vector<5x1024xf32>
    %30 = tpu.matmul %29, %27, %cst_33 {dimension_numbers = #tpu.dot_dimension_numbers<[1], [0], [0], [1], [0, 0, 1, 1], [], []>} : vector<5x10xbf16>, vector<10x1024xbf16>, vector<5x1024xf32> -> vector<5x1024xf32>
    %c0_34 = arith.constant 0 : index
    %c128_35 = arith.constant 128 : index
    %31 = vector.load %arg7[%c0_34, %c128_35] : memref<10x1280xbf16, #tpu.memory_space<vmem>>, vector<10x1024xbf16>
    %c1_36 = arith.constant 1 : index
    %c0_37 = arith.constant 0 : index
    %c0_38 = arith.constant 0 : index
    %32 = vector.load %arg4[%c1_36, %c0_37, %c0_38] : memref<3x5x10xbf16, #tpu.memory_space<vmem>>, vector<1x5x10xbf16>
    %33 = vector.shape_cast %32 : vector<1x5x10xbf16> to vector<5x10xbf16>
    %cst_39 = arith.constant dense<0.000000e+00> : vector<5x1024xf32>
    %34 = tpu.matmul %33, %31, %cst_39 {dimension_numbers = #tpu.dot_dimension_numbers<[1], [0], [0], [1], [0, 0, 1, 1], [], []>} : vector<5x10xbf16>, vector<10x1024xbf16>, vector<5x1024xf32> -> vector<5x1024xf32>
    %35 = arith.addf %30, %34 : vector<5x1024xf32>
    %c0_40 = arith.constant 0 : index
    %c256 = arith.constant 256 : index
    %36 = vector.load %arg7[%c0_40, %c256] : memref<10x1280xbf16, #tpu.memory_space<vmem>>, vector<10x1024xbf16>
    %c2_41 = arith.constant 2 : index
    %c0_42 = arith.constant 0 : index
    %c0_43 = arith.constant 0 : index
    %37 = vector.load %arg4[%c2_41, %c0_42, %c0_43] : memref<3x5x10xbf16, #tpu.memory_space<vmem>>, vector<1x5x10xbf16>
    %38 = vector.shape_cast %37 : vector<1x5x10xbf16> to vector<5x10xbf16>
    %cst_44 = arith.constant dense<0.000000e+00> : vector<5x1024xf32>
    %39 = tpu.matmul %38, %36, %cst_44 {dimension_numbers = #tpu.dot_dimension_numbers<[1], [0], [0], [1], [0, 0, 1, 1], [], []>} : vector<5x10xbf16>, vector<10x1024xbf16>, vector<5x1024xf32> -> vector<5x1024xf32>
    %40 = arith.addf %35, %39 : vector<5x1024xf32>
    %c0_45 = arith.constant 0 : index
    %c0_46 = arith.constant 0 : index
    %41 = vector.load %arg5[%c0_45, %c0_46] : memref<5x1xf32, #tpu.memory_space<vmem>>, vector<5x1xf32>
    %42 = vector.broadcast %41 : vector<5x1xf32> to vector<5x1024xf32>
    %43 = arith.addf %40, %42 : vector<5x1024xf32>
    %cst_47 = arith.constant 0.000000e+00 : f32
    %44 = vector.broadcast %cst_47 : f32 to vector<5x1024xf32>
    %45 = arith.maximumf %43, %44 : vector<5x1024xf32>
    %c0_48 = arith.constant 0 : index
    %c0_49 = arith.constant 0 : index
    %c0_50 = arith.constant 0 : index
    %46 = vector.load %arg6[%c0_48, %c0_49, %c0_50] : memref<1x5x1024xf32, #tpu.memory_space<vmem>>, vector<1x5x1024xf32>
    %47 = vector.shape_cast %46 : vector<1x5x1024xf32> to vector<5x1024xf32>
    %48 = vector.shape_cast %45 : vector<5x1024xf32> to vector<1x5x1024xf32>
    tpu.vector_store %arg6[%c0_48, %c0_49, %c0_50], %48 {strides = array<i32>} : memref<1x5x1024xf32, #tpu.memory_space<vmem>>, vector<1x5x1024xf32>,
    return
  }
  func.func @transform_0(%arg0: i32) -> (i32, i32, i32, i32) {
    %c0_i32 = arith.constant 0 : i32
    %c0_i32_0 = arith.constant 0 : i32
    %c0_i32_1 = arith.constant 0 : i32
    %c0_i32_2 = arith.constant 0 : i32
    return %arg0, %c0_i32, %c0_i32_0, %c0_i32_1 : i32, i32, i32, i32
  }
  func.func @transform_1(%arg0: i32) -> (i32, i32, i32) {
    %c0_i32 = arith.constant 0 : i32
    %c0_i32_0 = arith.constant 0 : i32
    %c0_i32_1 = arith.constant 0 : i32
    %c0_i32_2 = arith.constant 0 : i32
    return %c0_i32, %c0_i32_0, %c0_i32_1 : i32, i32, i32
  }
  func.func @transform_2(%arg0: i32) -> (i32, i32) {
    %c0_i32 = arith.constant 0 : i32
    %c0_i32_0 = arith.constant 0 : i32
    %c0_i32_1 = arith.constant 0 : i32
    return %c0_i32, %c0_i32_0 : i32, i32
  }
  func.func @transform_3(%arg0: i32) -> (i32, i32, i32) {
    %c0_i32 = arith.constant 0 : i32
    %c0_i32_0 = arith.constant 0 : i32
    %c0_i32_1 = arith.constant 0 : i32
    %c0_i32_2 = arith.constant 0 : i32
    return %c0_i32, %c0_i32_0, %c0_i32_1 : i32, i32, i32
  }
  func.func @transform_4(%arg0: i32) -> (i32, i32) {
    %c0_i32 = arith.constant 0 : i32
    %c0_i32_0 = arith.constant 0 : i32
    %c0_i32_1 = arith.constant 0 : i32
    return %c0_i32, %c0_i32_0 : i32, i32
  }
  func.func @transform_5(%arg0: i32) -> (i32, i32, i32) {
    %c0_i32 = arith.constant 0 : i32
    %c0_i32_0 = arith.constant 0 : i32
    %c0_i32_1 = arith.constant 0 : i32
    return %arg0, %c0_i32, %c0_i32_0 : i32, i32, i32
  }
}

</mosaic_0001>

<bundles_post_ra>
// kernel: _fused_forward.1
= control target key start
LH: loop header
LB: loop body
LE: loop exit
PB: predicated region body
PF: predicated region fallthrough
CT: control target
= control target key end

     0   :  { %v42_v0 = vlaneseq  ;;  %v1750_v2 = vmov 1983009808   ;;  %v1751_v4 = vmov 0   ;;  %vm76_vm0 = vcmask 1041408   ;;  %s1993_s0 = inlined_call_operand.vmem [shape: bf16[1,2,4,1152], index: 0, kind: input, shape index: {}]   ;;  %s1994_s1 = inlined_call_operand.vmem [shape: bf16[3,10,4], index: 1, kind: input, shape index: {}]   ;;  %s1995_s2 = inlined_call_operand.vmem [shape: f32[10,1], index: 2, kind: input, shape index: {}]   ;;  %s1996_s4 = inlined_call_operand.vmem [shape: f32[5,1], index: 4, kind: input, shape index: {}]   ;;  %s1997_s3 = inlined_call_operand.vmem [shape: bf16[3,5,10], index: 3, kind: input, shape index: {}]   ;;  %s1998_s5 = inlined_call_operand.vmem [shape: f32[1,5,1024], index: 5, kind: output, shape index: {}]  }
   0x1   :  { %v1620_v1 = vld [vmem:[%s1993_s0 + $0x12] sm:$0xff]  ;;  %v40_v3 = vunpack.c.l.s4 %v1750_v2  ;;  %133 = vmatprep.mubr.bf16.mxu0 %v1751_v4  ;;  %818 = vst [vmem:[#allocation2] sm:$0xf] %v1751_v4  ;;  %819 = vst [vmem:[#allocation2 + $0x28] sm:$0x1] %v1751_v4  ;;  %176 = vmatprep.mubr.bf16.mxu1 %v1751_v4  ;;  %v1621_v6 = vld [vmem:[%s1993_s0 + $0x1a] sm:$0xff] }
   0x2   :  { %820 = vst [vmem:[#allocation2 + $0x24] sm:$0xf] %v1751_v4  ;;  %821 = vst [vmem:[#allocation2 + $0x4c] sm:$0x1] %v1751_v4  ;;  %v43_v5 = vshrl.u32 %v42_v0, 7  ;;  %1721 = vset.pattern.permute.xlu0 %v1751_v4  ;;  %1722 = vset.pattern.permute.xlu1 %v1751_v4  ;;  %v38_v8 = vcombine.high %v1620_v1, %v1620_v1  ;;  %v55_v9 = vcombine.high %v1621_v6, %v1621_v6  ;;  %v21_v10 = vld [vmem:[%s1993_s0] sm:$0xff] }
   0x3   :  { %v41_v7 = vunpack.c.0.s8 %v40_v3  ;;  %v280_v12 = vcombine.high %v21_v10, %v21_v10  ;;  %v774_v13 = vld [vmem:[%s1995_s2] sm:$0xff]  ;;  %v1724_v26 = vld [vmem:[%s1994_s1 + $0x8] sm:$0x1f]   ;;  %vm72_vm1 = vcmask 31744   ;;  %v1730_v57 = vld [vmem:[%s1994_s1 + $0x10] sm:$0x1f]  }
   0x4   :  { %778 = vperm.xlu0 %1721, %v774_v13   ;;  %v22_v27 = vld [vmem:[%s1993_s0 + $0x8] sm:$0xff]  ;;  %v1727_v44 = vld [vmem:[%s1994_s1] sm:$0x1f]   ;;  %vm933_vm2 = vcmask 1044480   ;;  %vm929_vm3 = vcmask 80896  }
   0x5   :  { %v1799_v11 = vsub.s32 %v41_v7, %v43_v5  ;;  %v775_v28 = vld [vmem:[%s1995_s2 + $0x8] sm:$0x3]  ;;  %v297_v33 = vcombine.high %v22_v27, %v22_v27  ;;  %v514_v45 = vld [vmem:[%s1993_s0 + $0xa] sm:$0xff]  ;;  %v1586_v60 = vld [vmem:[%s1996_s4] sm:$0x1f] }
   0x6   :  { %v513_v36 = vld [vmem:[%s1993_s0 + $0x2] sm:$0xff]  ;;  %v542_v50 = vcombine.high %v514_v45, %v514_v45  ;;  %1589 = vperm.xlu1 %1722, %v1586_v60  }
   0x7   :  { %v45_v14 = vrot.slane %v1620_v1, %v1799_v11  ;;  %v52_v15 = vrot.slane %v38_v8, %v1799_v11  ;;  %v62_v16 = vrot.slane %v1621_v6, %v1799_v11  ;;  %v69_v17 = vrot.slane %v55_v9, %v1799_v11 }
   0x8   :  { %v287_v24 = vrot.slane %v21_v10, %v1799_v11  ;;  %v294_v25 = vrot.slane %v280_v12, %v1799_v11  ;;  %783 = vperm.xlu0 %1721, %v775_v28   ;;  %v304_v34 = vrot.slane %v22_v27, %v1799_v11  ;;  %v311_v35 = vrot.slane %v297_v33, %v1799_v11 }
   0x9   :  { %v53_v18 = vcombine.high %v45_v14, %v45_v14  ;;  %v54_v19 = vcombine.high %v52_v15, %v52_v15  ;;  %v78_v20 = vsel %vm76_vm0, %v45_v14, 0  ;;  %v84_v21 = vsel %vm76_vm0, %v52_v15, 0 }
   0xa   :  { %v70_v22 = vcombine.high %v62_v16, %v62_v16  ;;  %v71_v23 = vcombine.high %v69_v17, %v69_v17  ;;  %v90_v29 = vsel %vm76_vm0, %v62_v16, 0  ;;  %v96_v30 = vsel %vm76_vm0, %v69_v17, 0 }
   0xb   :  { %1625 = vmatprep.subr.msk.bf16.mxu0 %vm76_vm0, %v53_v18  ;;  %1627 = vmatprep.subr.msk.bf16.mxu1 %vm76_vm0, %v54_v19  ;;  %v295_v31 = vcombine.high %v287_v24, %v287_v24  ;;  %v296_v32 = vcombine.high %v294_v25, %v294_v25  ;;  %v318_v37 = vsel %vm76_vm0, %v287_v24, 0  ;;  %v324_v38 = vsel %vm76_vm0, %v294_v25, 0 }
   0xc   :  { %116 = vmatpush1.bf16.msra.mxu0 %v78_v20  ;;  %159 = vmatpush1.bf16.msra.mxu1 %v84_v21  ;;  %v312_v39 = vcombine.high %v304_v34, %v304_v34  ;;  %v313_v40 = vcombine.high %v311_v35, %v311_v35  ;;  %v525_v41 = vcombine.high %v513_v36, %v513_v36  ;;  %v330_v46 = vsel %vm76_vm0, %v304_v34, 0 }
   0xd   :  { %1629 = vmatprep.subr.msk.bf16.mxu0 %vm76_vm0, %v70_v22  ;;  %1631 = vmatprep.subr.msk.bf16.mxu1 %vm76_vm0, %v71_v23  ;;  %v532_v42 = vrot.slane %v513_v36, %v1799_v11  ;;  %v336_v47 = vsel %vm76_vm0, %v311_v35, 0  ;;  %v549_v51 = vrot.slane %v514_v45, %v1799_v11  ;;  %v556_v52 = vrot.slane %v542_v50, %v1799_v11 }
   0xe   :  { %v539_v43 = vrot.slane %v525_v41, %v1799_v11 }
   0xf   :  { %1626 = vmatmul.mubr.msk.bf16.vlgmr.msra.gmra.mxu0 %vm72_vm1, %v1724_v26  ;;  %1628 = vmatmul.mubr.msk.bf16.vlgmr.msra.gmra.mxu1 %vm72_vm1, %v1724_v26  ;;  %v540_v48 = vcombine.high %v532_v42, %v532_v42  ;;  %v563_v53 = vsel %vm76_vm0, %v532_v42, 0  ;;  %v557_v55 = vcombine.high %v549_v51, %v549_v51  ;;  %v558_v56 = vcombine.high %v556_v52, %v556_v52 }
  0x10   :  { %202 = vmatpush1.bf16.msra.mxu0 %v90_v29  ;;  %245 = vmatpush1.bf16.msra.mxu1 %v96_v30  ;;  %v541_v49 = vcombine.high %v539_v43, %v539_v43  ;;  %v569_v54 = vsel %vm76_vm0, %v539_v43, 0  ;;  %v575_v58 = vsel %vm76_vm0, %v549_v51, 0  ;;  %v581_v59 = vsel %vm76_vm0, %v556_v52, 0 }
  0x11   :  { %219 = vmatprep.mubr.bf16.mxu0 %v1751_v4  ;;  %262 = vmatprep.mubr.bf16.mxu1 %v1751_v4 }
  0x12   :  { %1634 = vmatprep.subr.msk.bf16.mxu0 %vm76_vm0, %v295_v31  ;;  %1636 = vmatprep.subr.msk.bf16.mxu1 %vm76_vm0, %v296_v32 }
  0x17   :  { %1630 = vmatmul.mubr.msk.bf16.vlgmr.msra.gmra.mxu0 %vm72_vm1, %v1724_v26  ;;  %1632 = vmatmul.mubr.msk.bf16.vlgmr.msra.gmra.mxu1 %vm72_vm1, %v1724_v26 }
  0x18   :  { %356 = vmatpush1.bf16.msra.mxu0 %v318_v37  ;;  %399 = vmatpush1.bf16.msra.mxu1 %v324_v38 }
  0x19   :  { %373 = vmatprep.mubr.bf16.mxu0 %v1751_v4  ;;  %416 = vmatprep.mubr.bf16.mxu1 %v1751_v4 }
  0x1a   :  { %1638 = vmatprep.subr.msk.bf16.mxu0 %vm76_vm0, %v312_v39  ;;  %1640 = vmatprep.subr.msk.bf16.mxu1 %vm76_vm0, %v313_v40 }
  0x1f   :  { %1635 = vmatmul.mubr.msk.bf16.vlgmr.msra.gmra.mxu0 %vm72_vm1, %v1727_v44  ;;  %1637 = vmatmul.mubr.msk.bf16.vlgmr.msra.gmra.mxu1 %vm72_vm1, %v1727_v44 }
  0x20   :  { %442 = vmatpush1.bf16.msra.mxu0 %v330_v46  ;;  %485 = vmatpush1.bf16.msra.mxu1 %v336_v47 }
  0x21   :  { %459 = vmatprep.mubr.bf16.mxu0 %v1751_v4  ;;  %502 = vmatprep.mubr.bf16.mxu1 %v1751_v4 }
  0x22   :  { %1645 = vmatprep.subr.msk.bf16.mxu0 %vm76_vm0, %v540_v48  ;;  %1647 = vmatprep.subr.msk.bf16.mxu1 %vm76_vm0, %v541_v49 }
  0x27   :  { %1639 = vmatmul.mubr.msk.bf16.vlgmr.msra.gmra.mxu0 %vm72_vm1, %v1727_v44  ;;  %1641 = vmatmul.mubr.msk.bf16.vlgmr.msra.gmra.mxu1 %vm72_vm1, %v1727_v44 }
  0x28   :  { %601 = vmatpush1.bf16.msra.mxu0 %v563_v53  ;;  %644 = vmatpush1.bf16.msra.mxu1 %v569_v54 }
  0x29   :  { %618 = vmatprep.mubr.bf16.mxu0 %v1751_v4  ;;  %661 = vmatprep.mubr.bf16.mxu1 %v1751_v4 }
  0x2a   :  { %1649 = vmatprep.subr.msk.bf16.mxu0 %vm76_vm0, %v557_v55  ;;  %1651 = vmatprep.subr.msk.bf16.mxu1 %vm76_vm0, %v558_v56 }
  0x2f   :  { %1646 = vmatmul.mubr.msk.bf16.vlgmr.msra.gmra.mxu0 %vm72_vm1, %v1730_v57  ;;  %1648 = vmatmul.mubr.msk.bf16.vlgmr.msra.gmra.mxu1 %vm72_vm1, %v1730_v57 }
  0x30   :  { %687 = vmatpush1.bf16.msra.mxu0 %v575_v58  ;;  %730 = vmatpush1.bf16.msra.mxu1 %v581_v59 }
  0x31   :  { %704 = vmatprep.mubr.bf16.mxu0 %v1751_v4  ;;  %747 = vmatprep.mubr.bf16.mxu1 %v1751_v4 }
  0x37   :  { %1650 = vmatmul.mubr.msk.bf16.vlgmr.msra.gmra.mxu0 %vm72_vm1, %v1730_v57  ;;  %1652 = vmatmul.mubr.msk.bf16.vlgmr.msra.gmra.mxu1 %vm72_vm1, %v1730_v57 }
  0x38   :  { %990 = vmatprep.mubr.bf16.mxu0 %v1751_v4  ;;  %1031 = vmatprep.mubr.bf16.mxu1 %v1751_v4 }
  0x7f   :  { %v1892_v36 = vpop.permute.xlu0 %778 }
  0xcf   :  { %v135_v61 = vpop.f32.mrf.mxu0  ;;  %v178_v62 = vpop.f32.mrf.mxu1 }
  0xd1   :  { %v137_v63 = vpop.f32.mrf.mxu0  ;;  %v180_v0 = vpop.f32.mrf.mxu1 }
  0xd3   :  { %v139_v1 = vpop.f32.mrf.mxu0  ;;  %v182_v2 = vpop.f32.mrf.mxu1 }
  0xd5   :  { %v141_v3 = vpop.f32.mrf.mxu0  ;;  %v184_v5 = vpop.f32.mrf.mxu1 }
  0xd7   :  { %v221_v6 = vpop.f32.mrf.mxu0  ;;  %v264_v7 = vpop.f32.mrf.mxu1 }
  0xd9   :  { %v223_v8 = vpop.f32.mrf.mxu0  ;;  %v266_v9 = vpop.f32.mrf.mxu1 }
  0xdb   :  { %v225_v10 = vpop.f32.mrf.mxu0  ;;  %v268_v11 = vpop.f32.mrf.mxu1 }
  0xdd   :  { %v1888_v12 = vpop.f32.mrf.mxu0  ;;  %v1890_v13 = vpop.f32.mrf.mxu1 }
  0xdf   :  { %v375_v14 = vpop.f32.mrf.mxu0  ;;  %v418_v15 = vpop.f32.mrf.mxu1 }
  0xe0   :  { %v376_v30 = vadd.f32 %v375_v14, %v135_v61  ;;  %v419_v31 = vadd.f32 %v418_v15, %v178_v62 }
  0xe1   :  { %v377_v16 = vpop.f32.mrf.mxu0  ;;  %v420_v17 = vpop.f32.mrf.mxu1 }
  0xe2   :  { %v378_v34 = vadd.f32 %v377_v16, %v137_v63  ;;  %v421_v35 = vadd.f32 %v420_v17, %v180_v0 }
  0xe3   :  { %v379_v18 = vpop.f32.mrf.mxu0  ;;  %v422_v19 = vpop.f32.mrf.mxu1 }
  0xe4   :  { %v380_v39 = vadd.f32 %v379_v18, %v139_v1  ;;  %v423_v40 = vadd.f32 %v422_v19, %v182_v2  ;;  %v784_v1 = vpop.permute.xlu0 %783 }
  0xe5   :  { %v381_v20 = vpop.f32.mrf.mxu0  ;;  %v424_v21 = vpop.f32.mrf.mxu1 }
  0xe6   :  { %v382_v47 = vadd.f32 %v381_v20, %v141_v3  ;;  %v425_v48 = vadd.f32 %v424_v21, %v184_v5 }
  0xe7   :  { %v461_v22 = vpop.f32.mrf.mxu0  ;;  %v504_v23 = vpop.f32.mrf.mxu1 }
  0xe8   :  { %v462_v49 = vadd.f32 %v461_v22, %v221_v6  ;;  %v505_v50 = vadd.f32 %v504_v23, %v264_v7 }
  0xe9   :  { %v463_v24 = vpop.f32.mrf.mxu0  ;;  %v506_v25 = vpop.f32.mrf.mxu1 }
  0xea   :  { %v464_v53 = vadd.f32 %v463_v24, %v223_v8  ;;  %v507_v54 = vadd.f32 %v506_v25, %v266_v9 }
  0xeb   :  { %v465_v26 = vpop.f32.mrf.mxu0  ;;  %v508_v27 = vpop.f32.mrf.mxu1 }
  0xec   :  { %v466_v5 = vadd.f32 %v465_v26, %v225_v10  ;;  %v509_v6 = vadd.f32 %v508_v27, %v268_v11 }
  0xed   :  { %v467_v28 = vpop.f32.mrf.mxu0  ;;  %v510_v29 = vpop.f32.mrf.mxu1 }
  0xee   :  { %v468_v27 = vadd.f32 %v467_v28, %v1888_v12 }
  0xef   :  { %v620_v32 = vpop.f32.mrf.mxu0  ;;  %v663_v33 = vpop.f32.mrf.mxu1 }
  0xf0   :  { %v758_v37 = vadd.f32 %v620_v32, %v376_v30  ;;  %v760_v38 = vadd.f32 %v663_v33, %v419_v31  ;;  %v511_v30 = vadd.f32 %v510_v29, %v1890_v13 }
  0xf1   :  { %v622_v41 = vpop.f32.mrf.mxu0  ;;  %v665_v42 = vpop.f32.mrf.mxu1 }
  0xf2   :  { %v786_v43 = vadd.f32 %v1892_v36, %v758_v37  ;;  %v788_v44 = vadd.f32 %v1892_v36, %v760_v38  ;;  %v759_v45 = vadd.f32 %v622_v41, %v378_v34  ;;  %v761_v46 = vadd.f32 %v665_v42, %v421_v35 }
  0xf3   :  { %v624_v51 = vpop.f32.mrf.mxu0  ;;  %v667_v52 = vpop.f32.mrf.mxu1 }
  0xf4   :  { %v787_v55 = vadd.f32 %v1892_v36, %v759_v45  ;;  %v789_v56 = vadd.f32 %v1892_v36, %v761_v46  ;;  %v802_v57 = vmax.f32 %v786_v43, 0.0  ;;  %v804_v58 = vmax.f32 %v788_v44, 0.0 }
  0xf5   :  { %v766_v59 = vadd.f32 %v624_v51, %v380_v39  ;;  %v768_v60 = vadd.f32 %v667_v52, %v423_v40  ;;  %v626_v61 = vpop.f32.mrf.mxu0  ;;  %v669_v62 = vpop.f32.mrf.mxu1 }
  0xf6   :  { %v803_v63 = vmax.f32 %v787_v55, 0.0  ;;  %v805_v0 = vmax.f32 %v789_v56, 0.0  ;;  %v767_v2 = vadd.f32 %v626_v61, %v382_v47  ;;  %v769_v3 = vadd.f32 %v669_v62, %v425_v48 }
  0xf7   :  { %v794_v7 = vadd.f32 %v784_v1, %v766_v59  ;;  %v796_v8 = vadd.f32 %v784_v1, %v768_v60  ;;  %v706_v9 = vpop.f32.mrf.mxu0  ;;  %v749_v14 = vpop.f32.mrf.mxu1 }
  0xf8   :  { %v1898_v15 = vpack.c.bf16 %v803_v63, %v802_v57  ;;  %v1900_v16 = vpack.c.bf16 %v805_v0, %v804_v58  ;;  %v795_v17 = vadd.f32 %v784_v1, %v767_v2  ;;  %v797_v18 = vadd.f32 %v784_v1, %v769_v3 }
  0xf9   :  { %v810_v19 = vmax.f32 %v794_v7, 0.0  ;;  %v812_v20 = vmax.f32 %v796_v8, 0.0  ;;  %v762_v21 = vadd.f32 %v706_v9, %v462_v49  ;;  %v764_v22 = vadd.f32 %v749_v14, %v505_v50  ;;  %v708_v23 = vpop.f32.mrf.mxu0  ;;  %v751_v24 = vpop.f32.mrf.mxu1 }
  0xfa   :  { %870 = vst [vmem:[#allocation2 + $0x4] sm:$0xff] %v1898_v15  ;;  %871 = vst [vmem:[#allocation2 + $0xc] sm:$0xff] %v1900_v16  ;;  %v811_v10 = vmax.f32 %v795_v17, 0.0  ;;  %v813_v11 = vmax.f32 %v797_v18, 0.0  ;;  %v763_v25 = vadd.f32 %v708_v23, %v464_v53  ;;  %v765_v26 = vadd.f32 %v751_v24, %v507_v54 }
  0xfb   :  { %v790_v31 = vadd.f32 %v1892_v36, %v762_v21  ;;  %v792_v32 = vadd.f32 %v1892_v36, %v764_v22  ;;  %v710_v33 = vpop.f32.mrf.mxu0  ;;  %v753_v34 = vpop.f32.mrf.mxu1 }
  0xfc   :  { %v1715_v35 = vpack.c.bf16 %v811_v10, %v810_v19  ;;  %v1716_v37 = vpack.c.bf16 %v813_v11, %v812_v20  ;;  %v791_v38 = vadd.f32 %v1892_v36, %v763_v25  ;;  %v793_v39 = vadd.f32 %v1892_v36, %v765_v26  ;;  %v1735_v19 = vld [vmem:[#allocation2] ss:$40 sps:$4 sm:$0x1f]  }
  0xfd   :  { %v806_v40 = vmax.f32 %v790_v31, 0.0  ;;  %v808_v41 = vmax.f32 %v792_v32, 0.0  ;;  %v770_v42 = vadd.f32 %v710_v33, %v466_v5  ;;  %v772_v43 = vadd.f32 %v753_v34, %v509_v6  ;;  %v712_v44 = vpop.f32.mrf.mxu0  ;;  %v755_v12 = vpop.f32.mrf.mxu1  ;;  %v886_v31 = vld [vmem:[%s1997_s3] sm:$0x7] }
  0xfe   :  { %874 = vst [vmem:[#allocation2 + $0x2c] sm:$0x11] %v1715_v35  ;;  %875 = vst [vmem:[#allocation2 + $0x34] sm:$0x11] %v1716_v37  ;;  %v807_v13 = vmax.f32 %v791_v38, 0.0  ;;  %v809_v28 = vmax.f32 %v793_v39, 0.0  ;;  %v771_v29 = vadd.f32 %v712_v44, %v468_v27  ;;  %v773_v45 = vadd.f32 %v755_v12, %v511_v30 }
  0xff   :  { %v798_v46 = vadd.f32 %v784_v1, %v770_v42  ;;  %v800_v47 = vadd.f32 %v784_v1, %v772_v43  ;;  %v1158_v10 = vsel %vm933_vm2, %v1735_v19, 0  ;;  %v1746_v12 = vld [vmem:[#allocation2 + $0x24] ss:$40 sps:$4 sm:$0x1f]  }
 0x100   :  { %v1713_v48 = vpack.c.bf16 %v807_v13, %v806_v40  ;;  %v1714_v49 = vpack.c.bf16 %v809_v28, %v808_v41  ;;  %v799_v50 = vadd.f32 %v784_v1, %v771_v29  ;;  %v801_v51 = vadd.f32 %v784_v1, %v773_v45  ;;  %v1661_v1 = vld [vmem:[%s1997_s3 + $0x4] sm:$0x7]  ;;  %v1694_v29 = vld [vmem:[%s1997_s3 + $0x8] sm:$0x7] }
 0x101   :  { %v814_v36 = vmax.f32 %v798_v46, 0.0  ;;  %v816_v52 = vmax.f32 %v800_v47, 0.0 }
 0x102   :  { %872 = vst [vmem:[#allocation2 + $0x14] sm:$0xff] %v1713_v48  ;;  %873 = vst [vmem:[#allocation2 + $0x1c] sm:$0xff] %v1714_v49  ;;  %v815_v53 = vmax.f32 %v799_v50, 0.0  ;;  %v817_v54 = vmax.f32 %v801_v51, 0.0 }
 0x104   :  { %v1717_v55 = vpack.c.bf16 %v815_v53, %v814_v36  ;;  %v1718_v56 = vpack.c.bf16 %v817_v54, %v816_v52 }
 0x105   :  { %v891_v57 = vld [vmem:[#allocation2 + $0x2c] sm:$0x11]  ;;  %v892_v58 = vld [vmem:[#allocation2 + $0x34] sm:$0x11] }
 0x106   :  { %876 = vst [vmem:[#allocation2 + $0x3c] sm:$0x11] %v1717_v55  ;;  %877 = vst [vmem:[#allocation2 + $0x44] sm:$0x11] %v1718_v56  ;;  %v1663_v59 = vcombine.high %v1898_v15, %v891_v57  ;;  %v1665_v60 = vcombine.high %v1900_v16, %v892_v58  ;;  %v1662_v61 = vcombine.low %v1898_v15, %v891_v57  ;;  %v883_v5 = vld [vmem:[#allocation2 + $0x30] sm:$0x11] }
 0x107   :  { %v1664_v62 = vcombine.low %v1900_v16, %v892_v58  ;;  %v1732_v14 = vld [vmem:[#allocation2 + $0x4] ss:$40 sps:$4 sm:$0x1f]   ;;  %v1349_v32 = vld [vmem:[#allocation2 + $0x30] sm:$0x11] }
 0x108   :  { %1670 = vmatprep.subr.msk.bf16.mxu0 %vm933_vm2, %v1663_v59  ;;  %1672 = vmatprep.subr.msk.bf16.mxu1 %vm933_vm2, %v1665_v60  ;;  %v935_v63 = vsel %vm933_vm2, %v1662_v61, 0  ;;  %v879_v15 = vld [vmem:[#allocation2 + $0x8] sm:$0xff] }
 0x109   :  { %v941_v0 = vsel %vm933_vm2, %v1664_v62, 0  ;;  %973 = vmatpush1.bf16.msra.mxu0 %v935_v63  ;;  %v1681_v18 = vcombine.high %v879_v15, %v883_v5  ;;  %v1680_v20 = vcombine.low %v879_v15, %v883_v5  ;;  %v880_v23 = vld [vmem:[#allocation2 + $0x10] sm:$0xff]  ;;  %v881_v24 = vld [vmem:[#allocation2 + $0x18] sm:$0xff]  ;;  %v1696_v37 = vcombine.high %v879_v15, %v1349_v32 }
 0x10a   :  { %1014 = vmatpush1.bf16.msra.mxu1 %v941_v0  ;;  %v1695_v39 = vcombine.low %v879_v15, %v1349_v32 }
 0x10b   :  { %v1164_v11 = vsel %vm933_vm2, %v1680_v20, 0  ;;  %v1590_v20 = vpop.permute.xlu1 %1589 }
 0x10c   :  { %1671 = vmatmul.mubr.msk.bf16.vlgmr.msra.gmra.mxu0 %vm929_vm3, %v1661_v1  ;;  %v1391_v42 = vsel %vm933_vm2, %v1695_v39, 0 }
 0x10d   :  { %1673 = vmatmul.mubr.msk.bf16.vlgmr.msra.gmra.mxu1 %vm929_vm3, %v1661_v1  ;;  %v893_v2 = vld [vmem:[#allocation2 + $0x3c] sm:$0x11]  ;;  %v894_v3 = vld [vmem:[#allocation2 + $0x44] sm:$0x11]  ;;  %1072 = vmatprep.mubr.bf16.mxu0 %v1751_v4 }
 0x10e   :  { %1113 = vmatprep.mubr.bf16.mxu1 %v1751_v4  ;;  %v1667_v6 = vcombine.high %v1713_v48, %v893_v2  ;;  %v1669_v7 = vcombine.high %v1714_v49, %v894_v3  ;;  %v1666_v8 = vcombine.low %v1713_v48, %v893_v2  ;;  %v1668_v9 = vcombine.low %v1714_v49, %v894_v3  ;;  %v884_v21 = vld [vmem:[#allocation2 + $0x38] sm:$0x11]  ;;  %v885_v22 = vld [vmem:[#allocation2 + $0x40] sm:$0x11] }
 0x10f   :  { %v1683_v25 = vcombine.high %v880_v23, %v884_v21  ;;  %v1685_v26 = vcombine.high %v881_v24, %v885_v22  ;;  %v1682_v27 = vcombine.low %v880_v23, %v884_v21  ;;  %v1684_v30 = vcombine.low %v881_v24, %v885_v22  ;;  %v1350_v33 = vld [vmem:[#allocation2 + $0x38] sm:$0x11]  ;;  %v1351_v41 = vld [vmem:[#allocation2 + $0x40] sm:$0x11] }
 0x110   :  { %1674 = vmatprep.subr.msk.bf16.mxu0 %vm933_vm2, %v1667_v6  ;;  %1676 = vmatprep.subr.msk.bf16.mxu1 %vm933_vm2, %v1669_v7  ;;  %v947_v16 = vsel %vm933_vm2, %v1666_v8, 0  ;;  %v953_v17 = vsel %vm933_vm2, %v1668_v9, 0  ;;  %v1698_v38 = vcombine.high %v880_v23, %v1350_v33  ;;  %v1697_v40 = vcombine.low %v880_v23, %v1350_v33  ;;  %v1749_v28 = vld [vmem:[#allocation2 + $0x20] ss:$40 sps:$4 sm:$0x1f]  }
 0x111   :  { %1055 = vmatpush1.bf16.msra.mxu0 %v947_v16  ;;  %1096 = vmatpush1.bf16.msra.mxu1 %v953_v17  ;;  %v1170_v34 = vsel %vm933_vm2, %v1682_v27, 0  ;;  %v1176_v35 = vsel %vm933_vm2, %v1684_v30, 0  ;;  %v1700_v44 = vcombine.high %v881_v24, %v1351_v41  ;;  %v1699_v13 = vcombine.low %v881_v24, %v1351_v41 }
 0x112   :  { %1686 = vmatprep.subr.msk.bf16.mxu0 %vm933_vm2, %v1732_v14  ;;  %1688 = vmatprep.subr.msk.bf16.mxu1 %vm933_vm2, %v1681_v18  ;;  %v1397_v43 = vsel %vm933_vm2, %v1697_v40, 0  ;;  %v1409_v46 = vsel %vm933_vm2, %v1749_v28, 0 }
 0x113   :  { %v1403_v45 = vsel %vm933_vm2, %v1699_v13, 0 }
 0x114   :  { %1675 = vmatmul.mubr.msk.bf16.vlgmr.msra.gmra.mxu0 %vm929_vm3, %v1661_v1 }
 0x115   :  { %1677 = vmatmul.mubr.msk.bf16.vlgmr.msra.gmra.mxu1 %vm929_vm3, %v1661_v1  ;;  %1196 = vmatpush1.bf16.msra.mxu0 %v1158_v10 }
 0x116   :  { %1237 = vmatpush1.bf16.msra.mxu1 %v1164_v11  ;;  %1690 = vmatprep.subr.msk.bf16.mxu0 %vm933_vm2, %v1683_v25 }
 0x117   :  { %1692 = vmatprep.subr.msk.bf16.mxu1 %vm933_vm2, %v1685_v26  ;;  %1213 = vmatprep.mubr.bf16.mxu0 %v1751_v4 }
 0x118   :  { %1254 = vmatprep.mubr.bf16.mxu1 %v1751_v4 }
 0x11c   :  { %1687 = vmatmul.mubr.msk.bf16.vlgmr.msra.gmra.mxu0 %vm929_vm3, %v886_v31 }
 0x11d   :  { %1689 = vmatmul.mubr.msk.bf16.vlgmr.msra.gmra.mxu1 %vm929_vm3, %v886_v31  ;;  %1278 = vmatpush1.bf16.msra.mxu0 %v1170_v34 }
 0x11e   :  { %1319 = vmatpush1.bf16.msra.mxu1 %v1176_v35  ;;  %1703 = vmatprep.subr.msk.bf16.mxu0 %vm933_vm2, %v1696_v37 }
 0x11f   :  { %1705 = vmatprep.subr.msk.bf16.mxu1 %vm933_vm2, %v1698_v38  ;;  %1295 = vmatprep.mubr.bf16.mxu0 %v1751_v4 }
 0x120   :  { %1336 = vmatprep.mubr.bf16.mxu1 %v1751_v4 }
 0x124   :  { %1691 = vmatmul.mubr.msk.bf16.vlgmr.msra.gmra.mxu0 %vm929_vm3, %v886_v31 }
 0x125   :  { %1693 = vmatmul.mubr.msk.bf16.vlgmr.msra.gmra.mxu1 %vm929_vm3, %v886_v31  ;;  %1429 = vmatpush1.bf16.msra.mxu0 %v1391_v42 }
 0x126   :  { %1470 = vmatpush1.bf16.msra.mxu1 %v1397_v43  ;;  %1707 = vmatprep.subr.msk.bf16.mxu0 %vm933_vm2, %v1700_v44 }
 0x127   :  { %1709 = vmatprep.subr.msk.bf16.mxu1 %vm933_vm2, %v1746_v12  ;;  %1446 = vmatprep.mubr.bf16.mxu0 %v1751_v4 }
 0x128   :  { %1487 = vmatprep.mubr.bf16.mxu1 %v1751_v4 }
 0x12c   :  { %1704 = vmatmul.mubr.msk.bf16.vlgmr.msra.gmra.mxu0 %vm929_vm3, %v1694_v29 }
 0x12d   :  { %1706 = vmatmul.mubr.msk.bf16.vlgmr.msra.gmra.mxu1 %vm929_vm3, %v1694_v29  ;;  %1511 = vmatpush1.bf16.msra.mxu0 %v1403_v45 }
 0x12e   :  { %1552 = vmatpush1.bf16.msra.mxu1 %v1409_v46  ;;  %1528 = vmatprep.mubr.bf16.mxu0 %v1751_v4 }
 0x12f   :  { %1569 = vmatprep.mubr.bf16.mxu1 %v1751_v4 }
 0x134   :  { %1708 = vmatmul.mubr.msk.bf16.vlgmr.msra.gmra.mxu0 %vm929_vm3, %v1694_v29 }
 0x135   :  { %1710 = vmatmul.mubr.msk.bf16.vlgmr.msra.gmra.mxu1 %vm929_vm3, %v1694_v29 }
 0x1cc   :  { %v992_v47 = vpop.f32.mrf.mxu0 }
 0x1cd   :  { %v1033_v48 = vpop.f32.mrf.mxu1 }
 0x1ce   :  { %v994_v49 = vpop.f32.mrf.mxu0 }
 0x1cf   :  { %v1035_v50 = vpop.f32.mrf.mxu1 }
 0x1d0   :  { %v996_v51 = vpop.f32.mrf.mxu0 }
 0x1d1   :  { %v1037_v36 = vpop.f32.mrf.mxu1 }
 0x1d2   :  { %v997_v52 = vpop.f32.mrf.mxu0 }
 0x1d3   :  { %v1038_v53 = vpop.f32.mrf.mxu1 }
 0x1d4   :  { %v1074_v54 = vpop.f32.mrf.mxu0 }
 0x1d5   :  { %v1115_v55 = vpop.f32.mrf.mxu1 }
 0x1d6   :  { %v1076_v56 = vpop.f32.mrf.mxu0 }
 0x1d7   :  { %v1117_v57 = vpop.f32.mrf.mxu1 }
 0x1d8   :  { %v1078_v58 = vpop.f32.mrf.mxu0 }
 0x1d9   :  { %v1119_v59 = vpop.f32.mrf.mxu1 }
 0x1da   :  { %v1079_v60 = vpop.f32.mrf.mxu0 }
 0x1db   :  { %v1120_v4 = vpop.f32.mrf.mxu1 }
 0x1dc   :  { %v1215_v61 = vpop.f32.mrf.mxu0 }
 0x1dd   :  { %v1256_v62 = vpop.f32.mrf.mxu1  ;;  %v1216_v18 = vadd.f32 %v1215_v61, %v992_v47 }
 0x1de   :  { %v1217_v63 = vpop.f32.mrf.mxu0  ;;  %v1257_v19 = vadd.f32 %v1256_v62, %v1033_v48 }
 0x1df   :  { %v1258_v0 = vpop.f32.mrf.mxu1  ;;  %v1218_v23 = vadd.f32 %v1217_v63, %v994_v49 }
 0x1e0   :  { %v1219_v1 = vpop.f32.mrf.mxu0  ;;  %v1259_v24 = vadd.f32 %v1258_v0, %v1035_v50 }
 0x1e1   :  { %v1260_v2 = vpop.f32.mrf.mxu1 }
 0x1e2   :  { %v1220_v3 = vpop.f32.mrf.mxu0 }
 0x1e3   :  { %v1261_v5 = vpop.f32.mrf.mxu1 }
 0x1e4   :  { %v1297_v6 = vpop.f32.mrf.mxu0 }
 0x1e5   :  { %v1338_v7 = vpop.f32.mrf.mxu1  ;;  %v1298_v42 = vadd.f32 %v1297_v6, %v1074_v54 }
 0x1e6   :  { %v1299_v8 = vpop.f32.mrf.mxu0  ;;  %v1339_v43 = vadd.f32 %v1338_v7, %v1115_v55 }
 0x1e7   :  { %v1340_v9 = vpop.f32.mrf.mxu1  ;;  %v1300_v29 = vadd.f32 %v1299_v8, %v1076_v56 }
 0x1e8   :  { %v1301_v14 = vpop.f32.mrf.mxu0  ;;  %v1341_v45 = vadd.f32 %v1340_v9, %v1117_v57 }
 0x1e9   :  { %v1342_v15 = vpop.f32.mrf.mxu1 }
 0x1ea   :  { %v1302_v16 = vpop.f32.mrf.mxu0 }
 0x1eb   :  { %v1343_v17 = vpop.f32.mrf.mxu1 }
 0x1ec   :  { %v1448_v21 = vpop.f32.mrf.mxu0 }
 0x1ed   :  { %v1489_v22 = vpop.f32.mrf.mxu1  ;;  %v1578_v10 = vadd.f32 %v1448_v21, %v1216_v18 }
 0x1ee   :  { %v1580_v11 = vadd.f32 %v1489_v22, %v1257_v19  ;;  %v1450_v25 = vpop.f32.mrf.mxu0 }
 0x1ef   :  { %v1491_v26 = vpop.f32.mrf.mxu1  ;;  %v1592_v27 = vadd.f32 %v1590_v20, %v1578_v10  ;;  %v1579_v31 = vadd.f32 %v1450_v25, %v1218_v23 }
 0x1f0   :  { %v1594_v30 = vadd.f32 %v1590_v20, %v1580_v11  ;;  %v1581_v32 = vadd.f32 %v1491_v26, %v1259_v24  ;;  %v1452_v33 = vpop.f32.mrf.mxu0 }
 0x1f1   :  { %v1493_v34 = vpop.f32.mrf.mxu1  ;;  %v1600_v35 = vmax.f32 %v1592_v27, 0.0  ;;  %v1593_v38 = vadd.f32 %v1590_v20, %v1579_v31 }
 0x1f2   :  { %v1602_v37 = vmax.f32 %v1594_v30, 0.0  ;;  %v1595_v39 = vadd.f32 %v1590_v20, %v1581_v32  ;;  %v1453_v40 = vpop.f32.mrf.mxu0 }
 0x1f3   :  { %v1494_v41 = vpop.f32.mrf.mxu1  ;;  %1608 = vst [vmem:[%s1998_s5] sm:$0x1f] %v1600_v35  ;;  %v1601_v44 = vmax.f32 %v1593_v38, 0.0 }
 0x1f4   :  { %1610 = vst [vmem:[%s1998_s5 + $0x10] sm:$0x1f] %v1602_v37  ;;  %v1603_v12 = vmax.f32 %v1595_v39, 0.0  ;;  %v1530_v13 = vpop.f32.mrf.mxu0 }
 0x1f5   :  { %v1571_v28 = vpop.f32.mrf.mxu1  ;;  %1609 = vst [vmem:[%s1998_s5 + $0x8] sm:$0x1f] %v1601_v44  ;;  %v1582_v46 = vadd.f32 %v1530_v13, %v1298_v42 }
 0x1f6   :  { %1611 = vst [vmem:[%s1998_s5 + $0x18] sm:$0x1f] %v1603_v12  ;;  %v1584_v47 = vadd.f32 %v1571_v28, %v1339_v43  ;;  %v1532_v48 = vpop.f32.mrf.mxu0 }
 0x1f7   :  { %v1573_v49 = vpop.f32.mrf.mxu1  ;;  %v1596_v50 = vadd.f32 %v1590_v20, %v1582_v46  ;;  %v1583_v36 = vadd.f32 %v1532_v48, %v1300_v29 }
 0x1f8   :  { %v1598_v51 = vadd.f32 %v1590_v20, %v1584_v47  ;;  %v1585_v52 = vadd.f32 %v1573_v49, %v1341_v45  ;;  %v1534_v53 = vpop.f32.mrf.mxu0 }
 0x1f9   :  { %v1575_v54 = vpop.f32.mrf.mxu1  ;;  %v1604_v55 = vmax.f32 %v1596_v50, 0.0  ;;  %v1597_v57 = vadd.f32 %v1590_v20, %v1583_v36 }
 0x1fa   :  { %v1606_v56 = vmax.f32 %v1598_v51, 0.0  ;;  %v1599_v58 = vadd.f32 %v1590_v20, %v1585_v52  ;;  %v1535_v59 = vpop.f32.mrf.mxu0 }
 0x1fb   :  { %v1576_v60 = vpop.f32.mrf.mxu1  ;;  %1612 = vst [vmem:[%s1998_s5 + $0x20] sm:$0x1f] %v1604_v55  ;;  %v1605_v4 = vmax.f32 %v1597_v57, 0.0 }
 0x1fc   :  { %1614 = vst [vmem:[%s1998_s5 + $0x30] sm:$0x1f] %v1606_v56  ;;  %v1607_v61 = vmax.f32 %v1599_v58, 0.0 }
 0x1fd   :  { %1613 = vst [vmem:[%s1998_s5 + $0x28] sm:$0x1f] %v1605_v4 }
 0x1fe   :  { %1615 = vst [vmem:[%s1998_s5 + $0x38] sm:$0x1f] %v1607_v61 }

</bundles_post_ra>
